<compile_context>
chip_gen: v7x
topology: tpu7x:2x2x1
jax: 0.10.0
libtpu: 0.0.40
codegen_flags: <defaults>
</compile_context>

<pallas_src>
import jax
import jax.numpy as jnp
from jax.experimental import pallas as pl
from jax.experimental.pallas import tpu as pltpu

HIDDEN = 20   # fc1 output features (PyTorch module hard-codes 20)
HPAD = 32     # lane-padded hidden width (== layer-2 contraction depth)


def _round_up(n, m):
    return ((n + m - 1) // m) * m


def actor_net_kernel(x_ref, p1_ref, p2_ref, o_ref):
    x = x_ref[...]                          # (TB, S) f32
    s = x.shape[1]
    hp = p1_ref.shape[1]                    # HPAD

    # --- Layer 1 on the MXU: h = x @ W1 + b1  (K = state_dim, N = HPAD).
    w1 = p1_ref[0:s, :]                     # (S, HPAD)
    b1 = p1_ref[s:s + 1, :]                 # (1, HPAD)
    h = jnp.dot(x, w1, preferred_element_type=jnp.float32) + b1
    h = jnp.maximum(h, 0.0)                 # F.relu; padded hidden lanes stay 0

    # --- Layer 2 on the MXU: y = h @ W2 + b2  (K = HPAD, N = AP).
    w2 = p2_ref[0:hp, :]                    # (HPAD, AP), zero-padded
    b2 = p2_ref[hp:hp + 1, :]               # (1, AP),    zero-padded
    y = jnp.dot(h, w2, preferred_element_type=jnp.float32) + b2
    o_ref[...] = y.astype(o_ref.dtype)


def pack_actor_params(w1, b1, w2, b2):
    """Pack and pad ActorNet params into two small f32 arrays.

    Returns (p1, p2):
      p1: (round_up(S+1, 8), HPAD)   rows [W1; b1; zero pad], lanes 0..19 used.
      p2: (round_up(HPAD+1, 8), AP)  rows [W2 (padded to HPAD); b2; zero pad].
    Call once per weight update; reuse for every forward call.
    """
    S, H = w1.shape
    A = w2.shape[-1]
    assert H == HIDDEN and H <= HPAD
    r1 = _round_up(S + 1, 8)
    r2 = _round_up(HPAD + 1, 8)
    ap = _round_up(A, 8)

    p1 = jnp.zeros((r1, HPAD), jnp.float32)
    p1 = p1.at[:S, :H].set(w1.astype(jnp.float32))
    p1 = p1.at[S, :H].set(jnp.reshape(b1, (-1,)).astype(jnp.float32))

    p2 = jnp.zeros((r2, ap), jnp.float32)
    p2 = p2.at[:H, :A].set(w2.astype(jnp.float32))
    p2 = p2.at[HPAD, :A].set(jnp.reshape(b2, (-1,)).astype(jnp.float32))
    return p1, p2


def _default_grid_steps(batch):
    """v7x has 2 TensorCores/chip -> two grid steps shard the batch across both.
    v5e/v6e are single-TC: extra grid steps only add ~0.35us fixed cost each."""
    try:
        kind = jax.devices()[0].device_kind.lower()
    except Exception:
        kind = ""
    if "v7" in kind and batch >= 16:
        return 2
    return 1


def actor_net_forward(x, p1, p2, action_dim, *, grid_steps=None, max_block=1024):
    """x: (B, state_dim) f32, (p1, p2) from pack_actor_params -> (B, action_dim) f32."""
    B, S = x.shape
    R1, HP = p1.shape
    R2, AP = p2.shape
    assert S + 1 <= R1 and HP + 1 <= R2 and action_dim <= AP
    assert max_block % 8 == 0

    steps = grid_steps if grid_steps is not None else _default_grid_steps(B)
    TB = min(_round_up(pl.cdiv(B, steps), 8), max_block)
    Bp = _round_up(B, TB)
    grid = (Bp // TB,)

    x = x.astype(jnp.float32)
    if Bp != B:
        # Only hit when B is not a multiple of the tile (e.g. B=1 acting loop).
        x = jnp.pad(x, ((0, Bp - B), (0, 0)))

    flops = 2 * Bp * (S * HP + HP * AP)
    bytes_accessed = 4 * (Bp * S + p1.size + p2.size + Bp * AP)

    out = pl.pallas_call(
        actor_net_kernel,
        out_shape=jax.ShapeDtypeStruct((Bp, AP), jnp.float32),
        grid_spec=pltpu.PrefetchScalarGridSpec(
            num_scalar_prefetch=0,
            grid=grid,
            in_specs=[
                pl.BlockSpec((TB, S), lambda i: (i, 0)),    # batch tile of x
                pl.BlockSpec((R1, HP), lambda i: (0, 0)),   # layer-1 params, resident
                pl.BlockSpec((R2, AP), lambda i: (0, 0)),   # layer-2 params, resident
            ],
            out_specs=pl.BlockSpec((TB, AP), lambda i: (i, 0)),
        ),
        compiler_params=pltpu.CompilerParams(
            dimension_semantics=("parallel",),              # shard batch across TCs (v7x)
        ),
        cost_estimate=pl.CostEstimate(
            flops=flops, transcendentals=0, bytes_accessed=bytes_accessed
        ),
    )(x, p1, p2)

    return out[:B, :action_dim]


def init_actor_params(key, state_dim, action_dim, hidden=HIDDEN):
    """Mimics torch.nn.Linear default init: U(-1/sqrt(fan_in), 1/sqrt(fan_in))."""
    k1, k2, k3, k4 = jax.random.split(key, 4)
    bound1 = 1.0 / jnp.sqrt(state_dim)
    bound2 = 1.0 / jnp.sqrt(hidden)
    # Stored as (in, out) == transpose of PyTorch's (out, in) weight.
    w1 = jax.random.uniform(k1, (state_dim, hidden), jnp.float32, -bound1, bound1)
    b1 = jax.random.uniform(k2, (1, hidden), jnp.float32, -bound1, bound1)
    w2 = jax.random.uniform(k3, (hidden, action_dim), jnp.float32, -bound2, bound2)
    b2 = jax.random.uniform(k4, (1, action_dim), jnp.float32, -bound2, bound2)
    return w1, b1, w2, b2


def actor_net_ref(x, w1, b1, w2, b2):
    """Pure-JAX reference for correctness check."""
    h = jnp.maximum(x @ w1 + b1, 0.0)
    return h @ w2 + b2


if __name__ == "__main__":
    # CartPole-v0: state_dim=4, action_dim=2.
    state_dim, action_dim, batch = 4, 2, 256
    key = jax.random.PRNGKey(0)
    kx, kp = jax.random.split(key)
    x = jax.random.normal(kx, (batch, state_dim), dtype=jnp.float32)
    w1, b1, w2, b2 = init_actor_params(kp, state_dim, action_dim)

    # Pack/pad params once; reused for every forward call below.
    p1, p2 = pack_actor_params(w1, b1, w2, b2)

    ref = actor_net_ref(x, w1, b1, w2, b2)

    # Batched forward (training / rollout batch).
    out = jax.block_until_ready(actor_net_forward(x, p1, p2, action_dim))
    assert out.shape == (batch, action_dim)
    assert jnp.allclose(out, ref, atol=1e-5, rtol=1e-5), "mismatch vs JAX reference (batched)"

    # Single-step acting-loop shape (B=1) reusing the same packed params.
    out1 = jax.block_until_ready(actor_net_forward(x[:1], p1, p2, action_dim))
    assert out1.shape == (1, action_dim)
    assert jnp.allclose(out1, ref[:1], atol=1e-5, rtol=1e-5), "mismatch vs JAX reference (B=1)"

    print("KERNEL_OK")
</pallas_src>

<mosaic_0001>
module attributes {stable_mosaic.version = 11 : i64} {
  func.func @actor_net_kernel(%arg0: i32, %arg1: memref<256x4xf32, #tpu.memory_space<vmem>>, %arg2: memref<8x32xf32, #tpu.memory_space<vmem>>, %arg3: memref<40x8xf32, #tpu.memory_space<vmem>>, %arg4: memref<256x8xf32, #tpu.memory_space<vmem>>) attributes {dimension_semantics = [#tpu.dimension_semantics<parallel>], iteration_bounds = array<i64: 1>, scalar_prefetch = 0 : i64, scratch_operands = 0 : i64, tpu.core_type = #tpu.core_type<tc>, window_params = [{transform_indices = @transform_0, window_bounds = array<i64: 256, 4>}, {pipeline_mode = #tpu.pipeline_mode<synchronous>, transform_indices = @transform_1, window_bounds = array<i64: 8, 32>}, {pipeline_mode = #tpu.pipeline_mode<synchronous>, transform_indices = @transform_2, window_bounds = array<i64: 40, 8>}, {transform_indices = @transform_3, window_bounds = array<i64: 256, 8>}]} {
    %c0 = arith.constant 0 : index
    %c0_0 = arith.constant 0 : index
    %0 = vector.load %arg1[%c0, %c0_0] : memref<256x4xf32, #tpu.memory_space<vmem>>, vector<256x4xf32>
    %c0_1 = arith.constant 0 : index
    %c0_2 = arith.constant 0 : index
    %1 = vector.load %arg2[%c0_1, %c0_2] : memref<8x32xf32, #tpu.memory_space<vmem>>, vector<4x32xf32>
    %c4 = arith.constant 4 : index
    %c0_3 = arith.constant 0 : index
    %2 = vector.load %arg2[%c4, %c0_3] : memref<8x32xf32, #tpu.memory_space<vmem>>, vector<1x32xf32>
    %cst = arith.constant dense<0.000000e+00> : vector<256x32xf32>
    %3 = tpu.matmul %0, %1, %cst {dimension_numbers = #tpu.dot_dimension_numbers<[1], [0], [0], [1], [0, 0, 1, 1], [], []>} : vector<256x4xf32>, vector<4x32xf32>, vector<256x32xf32> -> vector<256x32xf32>
    %4 = vector.broadcast %2 : vector<1x32xf32> to vector<256x32xf32>
    %5 = arith.addf %3, %4 : vector<256x32xf32>
    %cst_4 = arith.constant 0.000000e+00 : f32
    %6 = vector.broadcast %cst_4 : f32 to vector<256x32xf32>
    %7 = arith.maximumf %5, %6 : vector<256x32xf32>
    %c0_5 = arith.constant 0 : index
    %c0_6 = arith.constant 0 : index
    %8 = vector.load %arg3[%c0_5, %c0_6] : memref<40x8xf32, #tpu.memory_space<vmem>>, vector<32x8xf32>
    %c32 = arith.constant 32 : index
    %c0_7 = arith.constant 0 : index
    %9 = vector.load %arg3[%c32, %c0_7] : memref<40x8xf32, #tpu.memory_space<vmem>>, vector<1x8xf32>
    %cst_8 = arith.constant dense<0.000000e+00> : vector<256x8xf32>
    %10 = tpu.matmul %7, %8, %cst_8 {dimension_numbers = #tpu.dot_dimension_numbers<[1], [0], [0], [1], [0, 0, 1, 1], [], []>} : vector<256x32xf32>, vector<32x8xf32>, vector<256x8xf32> -> vector<256x8xf32>
    %11 = vector.broadcast %9 : vector<1x8xf32> to vector<256x8xf32>
    %12 = arith.addf %10, %11 : vector<256x8xf32>
    %c0_9 = arith.constant 0 : index
    %c0_10 = arith.constant 0 : index
    %13 = vector.load %arg4[%c0_9, %c0_10] : memref<256x8xf32, #tpu.memory_space<vmem>>, vector<256x8xf32>
    tpu.vector_store %arg4[%c0_9, %c0_10], %12 {strides = array<i32>} : memref<256x8xf32, #tpu.memory_space<vmem>>, vector<256x8xf32>,
    return
  }
  func.func @transform_0(%arg0: i32) -> (i32, i32) {
    %c0_i32 = arith.constant 0 : i32
    %c0_i32_0 = arith.constant 0 : i32
    return %arg0, %c0_i32 : i32, i32
  }
  func.func @transform_1(%arg0: i32) -> (i32, i32) {
    %c0_i32 = arith.constant 0 : i32
    %c0_i32_0 = arith.constant 0 : i32
    %c0_i32_1 = arith.constant 0 : i32
    return %c0_i32, %c0_i32_0 : i32, i32
  }
  func.func @transform_2(%arg0: i32) -> (i32, i32) {
    %c0_i32 = arith.constant 0 : i32
    %c0_i32_0 = arith.constant 0 : i32
    %c0_i32_1 = arith.constant 0 : i32
    return %c0_i32, %c0_i32_0 : i32, i32
  }
  func.func @transform_3(%arg0: i32) -> (i32, i32) {
    %c0_i32 = arith.constant 0 : i32
    %c0_i32_0 = arith.constant 0 : i32
    return %arg0, %c0_i32 : i32, i32
  }
}

</mosaic_0001>

<bundles_post_ra>
// kernel: tpu_custom_call.1
= control target key start
LH: loop header
LB: loop body
LE: loop exit
PB: predicated region body
PF: predicated region fallthrough
CT: control target
= control target key end

     0   :  { %vm149_vm0 = vcmask 1043456   ;;  %vm52_vm1 = vcmask 31744   ;;  %vm419_vm2 = vcmask 261120   ;;  %vm741_vm3 = vcmask 64512   ;;  %s1425_s1 = inlined_call_operand.vmem [shape: f32[8,32], index: 1, kind: input, shape index: {}]   ;;  %s1426_s0 = inlined_call_operand.vmem [shape: f32[256,4], index: 0, kind: input, shape index: {}]   ;;  %s1427_s2 = inlined_call_operand.vmem [shape: f32[40,8], index: 2, kind: input, shape index: {}]   ;;  %s1428_s3 = inlined_call_operand.vmem [shape: f32[256,8], index: 3, kind: output, shape index: {}]  }
   0x1   :  { %v46_v0 = vld [vmem:[%s1425_s1] sm:$0xf]  ;;  %v15_v2 = vld [vmem:[%s1426_s0 + $0x8] sm:$0xff]  ;;  %v16_v3 = vld [vmem:[%s1426_s0 + $0x10] sm:$0xff] }
   0x2   :  { %v14_v1 = vld [vmem:[%s1426_s0] sm:$0xff]  ;;  %914 = vmatprep.subr.msk.mxu0 %vm149_vm0, %v46_v0  ;;  %v17_v4 = vld [vmem:[%s1426_s0 + $0x18] sm:$0xff]  ;;  %v19_v6 = vld [vmem:[%s1426_s0 + $0x28] sm:$0xff] }
   0x3   :  { %916 = vmatprep.mubr.msk.f32.mxu0 %vm52_vm1, %v14_v1  ;;  %915 = vmatpush3.msk.msra.mxu0 %vm149_vm0, %v46_v0  ;;  %v18_v5 = vld [vmem:[%s1426_s0 + $0x20] sm:$0xff]  ;;  %v20_v7 = vld [vmem:[%s1426_s0 + $0x30] sm:$0xff]  ;;  %v411_v9 = vld [vmem:[%s1427_s2 + $0x8] sm:$0xff] }
   0x4   :  { %917 = vmatmul.mubr.msk.f32.vlgmr.msra.gmra.mrb[0].mxu0 %vm52_vm1, %v15_v2  ;;  %v410_v8 = vld [vmem:[%s1427_s2] sm:$0xff]  ;;  %v21_v10 = vld [vmem:[%s1426_s0 + $0x38] sm:$0xff]  ;;  %v23_v13 = vld [vmem:[%s1426_s0 + $0x48] sm:$0xff] }
   0x5   :  { %919 = vmatprep.mubr.msk.f32.mxu0 %vm52_vm1, %v16_v3  ;;  %v1020_v11 = vpack.c.bf16 %v411_v9, %v410_v8  ;;  %v22_v12 = vld [vmem:[%s1426_s0 + $0x40] sm:$0xff]  ;;  %v24_v14 = vld [vmem:[%s1426_s0 + $0x50] sm:$0xff]  ;;  %v25_v15 = vld [vmem:[%s1426_s0 + $0x58] sm:$0xff] }
   0x6   :  { %v26_v16 = vld [vmem:[%s1426_s0 + $0x60] sm:$0xff]  ;;  %v27_v17 = vld [vmem:[%s1426_s0 + $0x68] sm:$0xff]  ;;  %v28_v18 = vld [vmem:[%s1426_s0 + $0x70] sm:$0xff] }
   0x7   :  { %1021 = vmatprep.subr.bf16.mxu1 %v1020_v11  ;;  %v29_v19 = vld [vmem:[%s1426_s0 + $0x78] sm:$0xff]  ;;  %v30_v20 = vld [vmem:[%s1426_s0 + $0x80] sm:$0xff]  ;;  %v31_v21 = vld [vmem:[%s1426_s0 + $0x88] sm:$0xff] }
   0x8   :  { %920 = vmatmul.mubr.msk.f32.gmra.mrb[2].mxu0 %vm52_vm1, %v17_v4  ;;  %1023 = vmatpush3.bf16.msra.mxu1 %v1020_v11  ;;  %v32_v22 = vld [vmem:[%s1426_s0 + $0x90] sm:$0xff]  ;;  %v33_v23 = vld [vmem:[%s1426_s0 + $0x98] sm:$0xff]  ;;  %v34_v24 = vld [vmem:[%s1426_s0 + $0xa0] sm:$0xff] }
   0x9   :  { %922 = vmatprep.mubr.msk.f32.mxu0 %vm52_vm1, %v18_v5  ;;  %v35_v25 = vld [vmem:[%s1426_s0 + $0xa8] sm:$0xff]  ;;  %v36_v26 = vld [vmem:[%s1426_s0 + $0xb0] sm:$0xff]  ;;  %v37_v27 = vld [vmem:[%s1426_s0 + $0xb8] sm:$0xff] }
   0xa   :  { %v38_v28 = vld [vmem:[%s1426_s0 + $0xc0] sm:$0xff]  ;;  %v39_v29 = vld [vmem:[%s1426_s0 + $0xc8] sm:$0xff]  ;;  %v40_v30 = vld [vmem:[%s1426_s0 + $0xd0] sm:$0xff] }
   0xb   :  { %v41_v31 = vld [vmem:[%s1426_s0 + $0xd8] sm:$0xff]  ;;  %v42_v32 = vld [vmem:[%s1426_s0 + $0xe0] sm:$0xff]  ;;  %v43_v33 = vld [vmem:[%s1426_s0 + $0xe8] sm:$0xff] }
   0xc   :  { %923 = vmatmul.mubr.msk.f32.gmra.mrb[4].mxu0 %vm52_vm1, %v19_v6  ;;  %v44_v34 = vld [vmem:[%s1426_s0 + $0xf0] sm:$0xff]  ;;  %v45_v35 = vld [vmem:[%s1426_s0 + $0xf8] sm:$0xff]  ;;  %v1194_v39 = vld [vmem:[%s1425_s1 + $0x4] ss:$0 sm:$0xff] }
   0xd   :  { %925 = vmatprep.mubr.msk.f32.mxu0 %vm52_vm1, %v20_v7  ;;  %v412_v36 = vld [vmem:[%s1427_s2 + $0x10] sm:$0xff]  ;;  %v413_v37 = vld [vmem:[%s1427_s2 + $0x18] sm:$0xff] }
   0xe   :  { %v1024_v38 = vpack.c.bf16 %v413_v37, %v412_v36 }
  0x10   :  { %926 = vmatmul.mubr.msk.f32.gmra.mrb[6].mxu0 %vm52_vm1, %v21_v10  ;;  %1025 = vmatprep.subr.bf16.mxu1 %v1024_v38 }
  0x11   :  { %928 = vmatprep.mubr.msk.f32.mxu0 %vm52_vm1, %v22_v12  ;;  %1027 = vmatpush3.bf16.msra.mxu1 %v1024_v38 }
  0x14   :  { %929 = vmatmul.mubr.msk.f32.gmra.mrb[8].mxu0 %vm52_vm1, %v23_v13 }
  0x15   :  { %931 = vmatprep.mubr.msk.f32.mxu0 %vm52_vm1, %v24_v14 }
  0x18   :  { %932 = vmatmul.mubr.msk.f32.gmra.mrb[10].mxu0 %vm52_vm1, %v25_v15 }
  0x19   :  { %934 = vmatprep.mubr.msk.f32.mxu0 %vm52_vm1, %v26_v16 }
  0x1c   :  { %935 = vmatmul.mubr.msk.f32.gmra.mrb[12].mxu0 %vm52_vm1, %v27_v17 }
  0x1d   :  { %937 = vmatprep.mubr.msk.f32.mxu0 %vm52_vm1, %v28_v18 }
  0x20   :  { %938 = vmatmul.mubr.msk.f32.gmra.mrb[14].mxu0 %vm52_vm1, %v29_v19 }
  0x21   :  { %940 = vmatprep.mubr.msk.f32.mxu0 %vm52_vm1, %v30_v20 }
  0x24   :  { %941 = vmatmul.mubr.msk.f32.gmra.mrb[16].mxu0 %vm52_vm1, %v31_v21 }
  0x25   :  { %943 = vmatprep.mubr.msk.f32.mxu0 %vm52_vm1, %v32_v22 }
  0x28   :  { %944 = vmatmul.mubr.msk.f32.gmra.mrb[18].mxu0 %vm52_vm1, %v33_v23 }
  0x29   :  { %946 = vmatprep.mubr.msk.f32.mxu0 %vm52_vm1, %v34_v24 }
  0x2c   :  { %947 = vmatmul.mubr.msk.f32.gmra.mrb[20].mxu0 %vm52_vm1, %v35_v25 }
  0x2d   :  { %949 = vmatprep.mubr.msk.f32.mxu0 %vm52_vm1, %v36_v26 }
  0x30   :  { %950 = vmatmul.mubr.msk.f32.gmra.mrb[22].mxu0 %vm52_vm1, %v37_v27 }
  0x31   :  { %952 = vmatprep.mubr.msk.f32.mxu0 %vm52_vm1, %v38_v28 }
  0x34   :  { %953 = vmatmul.mubr.msk.f32.gmra.mrb[24].mxu0 %vm52_vm1, %v39_v29 }
  0x35   :  { %955 = vmatprep.mubr.msk.f32.mxu0 %vm52_vm1, %v40_v30 }
  0x38   :  { %956 = vmatmul.mubr.msk.f32.gmra.mrb[26].mxu0 %vm52_vm1, %v41_v31 }
  0x39   :  { %958 = vmatprep.mubr.msk.f32.mxu0 %vm52_vm1, %v42_v32 }
  0x3c   :  { %959 = vmatmul.mubr.msk.f32.gmra.mrb[28].mxu0 %vm52_vm1, %v43_v33 }
  0x3d   :  { %961 = vmatprep.mubr.msk.f32.mxu0 %vm52_vm1, %v44_v34 }
  0x40   :  { %962 = vmatmul.mubr.msk.f32.gmra.mrb[30].mxu0 %vm52_vm1, %v45_v35 }
  0xd7   :  { %v918_v40 = vpop.f32.mrb[0].mxu0 }
  0xd8   :  { %v225_v41 = vadd.f32 %v918_v40, %v1194_v39  ;;  %v219_v42 = vpop.f32.mrb[1].mxu0 }
  0xd9   :  { %v220_v43 = vadd.f32 %v1194_v39, %v219_v42 }
  0xda   :  { %v379_v46 = vmax.f32 %v225_v41, 0.0 }
  0xdb   :  { %v378_v44 = vmax.f32 %v220_v43, 0.0  ;;  %v921_v45 = vpop.f32.mrb[2].mxu0 }
  0xdc   :  { %v235_v47 = vadd.f32 %v921_v45, %v1194_v39  ;;  %v229_v48 = vpop.f32.mrb[3].mxu0 }
  0xdd   :  { %v230_v49 = vadd.f32 %v1194_v39, %v229_v48  ;;  %972 = vmatprep.mubr.msk.f32.mxu1 %vm419_vm2, %v378_v44 }
  0xde   :  { %973 = vmatmul.mubr.msk.f32.vlgmr.msra.gmra.mrb[0].mxu1 %vm419_vm2, %v379_v46  ;;  %v381_v52 = vmax.f32 %v235_v47, 0.0 }
  0xdf   :  { %v380_v50 = vmax.f32 %v230_v49, 0.0  ;;  %v924_v51 = vpop.f32.mrb[4].mxu0 }
  0xe0   :  { %v245_v53 = vadd.f32 %v924_v51, %v1194_v39  ;;  %v239_v54 = vpop.f32.mrb[5].mxu0 }
  0xe1   :  { %v240_v55 = vadd.f32 %v1194_v39, %v239_v54  ;;  %975 = vmatprep.mubr.msk.f32.mxu1 %vm419_vm2, %v380_v50 }
  0xe2   :  { %976 = vmatmul.mubr.msk.f32.gmra.mrb[2].mxu1 %vm419_vm2, %v381_v52  ;;  %v383_v58 = vmax.f32 %v245_v53, 0.0 }
  0xe3   :  { %v382_v56 = vmax.f32 %v240_v55, 0.0  ;;  %v927_v57 = vpop.f32.mrb[6].mxu0 }
  0xe4   :  { %v255_v59 = vadd.f32 %v927_v57, %v1194_v39  ;;  %v249_v60 = vpop.f32.mrb[7].mxu0 }
  0xe5   :  { %v250_v61 = vadd.f32 %v1194_v39, %v249_v60  ;;  %978 = vmatprep.mubr.msk.f32.mxu1 %vm419_vm2, %v382_v56 }
  0xe6   :  { %979 = vmatmul.mubr.msk.f32.gmra.mrb[4].mxu1 %vm419_vm2, %v383_v58  ;;  %v385_v0 = vmax.f32 %v255_v59, 0.0 }
  0xe7   :  { %v384_v62 = vmax.f32 %v250_v61, 0.0  ;;  %v930_v63 = vpop.f32.mrb[8].mxu0 }
  0xe8   :  { %v265_v1 = vadd.f32 %v930_v63, %v1194_v39  ;;  %v259_v2 = vpop.f32.mrb[9].mxu0 }
  0xe9   :  { %v260_v3 = vadd.f32 %v1194_v39, %v259_v2  ;;  %981 = vmatprep.mubr.msk.f32.mxu1 %vm419_vm2, %v384_v62 }
  0xea   :  { %982 = vmatmul.mubr.msk.f32.gmra.mrb[6].mxu1 %vm419_vm2, %v385_v0  ;;  %v387_v6 = vmax.f32 %v265_v1, 0.0 }
  0xeb   :  { %v386_v4 = vmax.f32 %v260_v3, 0.0  ;;  %v933_v5 = vpop.f32.mrb[10].mxu0 }
  0xec   :  { %v275_v7 = vadd.f32 %v933_v5, %v1194_v39  ;;  %v269_v8 = vpop.f32.mrb[11].mxu0 }
  0xed   :  { %v270_v9 = vadd.f32 %v1194_v39, %v269_v8  ;;  %984 = vmatprep.mubr.msk.f32.mxu1 %vm419_vm2, %v386_v4 }
  0xee   :  { %985 = vmatmul.mubr.msk.f32.gmra.mrb[8].mxu1 %vm419_vm2, %v387_v6  ;;  %v389_v12 = vmax.f32 %v275_v7, 0.0 }
  0xef   :  { %v388_v10 = vmax.f32 %v270_v9, 0.0  ;;  %v936_v11 = vpop.f32.mrb[12].mxu0  ;;  %v1263_v9 = vld [vmem:[%s1427_s2 + $0x20] ss:$0 sm:$0xff] }
  0xf0   :  { %v285_v13 = vadd.f32 %v936_v11, %v1194_v39  ;;  %v279_v14 = vpop.f32.mrb[13].mxu0 }
  0xf1   :  { %v280_v15 = vadd.f32 %v1194_v39, %v279_v14  ;;  %987 = vmatprep.mubr.msk.f32.mxu1 %vm419_vm2, %v388_v10 }
  0xf2   :  { %988 = vmatmul.mubr.msk.f32.gmra.mrb[10].mxu1 %vm419_vm2, %v389_v12  ;;  %v391_v18 = vmax.f32 %v285_v13, 0.0 }
  0xf3   :  { %v390_v16 = vmax.f32 %v280_v15, 0.0  ;;  %v939_v17 = vpop.f32.mrb[14].mxu0 }
  0xf4   :  { %v295_v19 = vadd.f32 %v939_v17, %v1194_v39  ;;  %v289_v20 = vpop.f32.mrb[15].mxu0 }
  0xf5   :  { %v290_v21 = vadd.f32 %v1194_v39, %v289_v20  ;;  %990 = vmatprep.mubr.msk.f32.mxu1 %vm419_vm2, %v390_v16 }
  0xf6   :  { %991 = vmatmul.mubr.msk.f32.gmra.mrb[12].mxu1 %vm419_vm2, %v391_v18  ;;  %v393_v24 = vmax.f32 %v295_v19, 0.0 }
  0xf7   :  { %v392_v22 = vmax.f32 %v290_v21, 0.0  ;;  %v942_v23 = vpop.f32.mrb[16].mxu0 }
  0xf8   :  { %v305_v25 = vadd.f32 %v942_v23, %v1194_v39  ;;  %v299_v26 = vpop.f32.mrb[17].mxu0 }
  0xf9   :  { %v300_v27 = vadd.f32 %v1194_v39, %v299_v26  ;;  %993 = vmatprep.mubr.msk.f32.mxu1 %vm419_vm2, %v392_v22 }
  0xfa   :  { %994 = vmatmul.mubr.msk.f32.gmra.mrb[14].mxu1 %vm419_vm2, %v393_v24  ;;  %v395_v30 = vmax.f32 %v305_v25, 0.0 }
  0xfb   :  { %v394_v28 = vmax.f32 %v300_v27, 0.0  ;;  %v945_v29 = vpop.f32.mrb[18].mxu0 }
  0xfc   :  { %v315_v31 = vadd.f32 %v945_v29, %v1194_v39  ;;  %v309_v32 = vpop.f32.mrb[19].mxu0 }
  0xfd   :  { %v310_v33 = vadd.f32 %v1194_v39, %v309_v32  ;;  %996 = vmatprep.mubr.msk.f32.mxu1 %vm419_vm2, %v394_v28 }
  0xfe   :  { %997 = vmatmul.mubr.msk.f32.gmra.mrb[16].mxu1 %vm419_vm2, %v395_v30  ;;  %v397_v36 = vmax.f32 %v315_v31, 0.0 }
  0xff   :  { %v396_v34 = vmax.f32 %v310_v33, 0.0  ;;  %v948_v35 = vpop.f32.mrb[20].mxu0 }
 0x100   :  { %v325_v37 = vadd.f32 %v948_v35, %v1194_v39  ;;  %v319_v38 = vpop.f32.mrb[21].mxu0 }
 0x101   :  { %v320_v40 = vadd.f32 %v1194_v39, %v319_v38  ;;  %999 = vmatprep.mubr.msk.f32.mxu1 %vm419_vm2, %v396_v34 }
 0x102   :  { %1000 = vmatmul.mubr.msk.f32.gmra.mrb[18].mxu1 %vm419_vm2, %v397_v36  ;;  %v399_v43 = vmax.f32 %v325_v37, 0.0 }
 0x103   :  { %v398_v41 = vmax.f32 %v320_v40, 0.0  ;;  %v951_v42 = vpop.f32.mrb[22].mxu0 }
 0x104   :  { %v335_v44 = vadd.f32 %v951_v42, %v1194_v39  ;;  %v329_v45 = vpop.f32.mrb[23].mxu0 }
 0x105   :  { %v330_v46 = vadd.f32 %v1194_v39, %v329_v45  ;;  %1002 = vmatprep.mubr.msk.f32.mxu1 %vm419_vm2, %v398_v41 }
 0x106   :  { %1003 = vmatmul.mubr.msk.f32.gmra.mrb[20].mxu1 %vm419_vm2, %v399_v43  ;;  %v401_v49 = vmax.f32 %v335_v44, 0.0 }
 0x107   :  { %v400_v47 = vmax.f32 %v330_v46, 0.0  ;;  %v954_v48 = vpop.f32.mrb[24].mxu0 }
 0x108   :  { %v345_v50 = vadd.f32 %v954_v48, %v1194_v39  ;;  %v339_v51 = vpop.f32.mrb[25].mxu0 }
 0x109   :  { %v340_v52 = vadd.f32 %v1194_v39, %v339_v51  ;;  %1005 = vmatprep.mubr.msk.f32.mxu1 %vm419_vm2, %v400_v47 }
 0x10a   :  { %1006 = vmatmul.mubr.msk.f32.gmra.mrb[22].mxu1 %vm419_vm2, %v401_v49  ;;  %v403_v55 = vmax.f32 %v345_v50, 0.0 }
 0x10b   :  { %v402_v53 = vmax.f32 %v340_v52, 0.0  ;;  %v957_v54 = vpop.f32.mrb[26].mxu0 }
 0x10c   :  { %v355_v56 = vadd.f32 %v957_v54, %v1194_v39  ;;  %v349_v57 = vpop.f32.mrb[27].mxu0 }
 0x10d   :  { %v350_v58 = vadd.f32 %v1194_v39, %v349_v57  ;;  %1008 = vmatprep.mubr.msk.f32.mxu1 %vm419_vm2, %v402_v53 }
 0x10e   :  { %1009 = vmatmul.mubr.msk.f32.gmra.mrb[24].mxu1 %vm419_vm2, %v403_v55  ;;  %v405_v61 = vmax.f32 %v355_v56, 0.0 }
 0x10f   :  { %v404_v59 = vmax.f32 %v350_v58, 0.0  ;;  %v960_v60 = vpop.f32.mrb[28].mxu0 }
 0x110   :  { %v365_v62 = vadd.f32 %v960_v60, %v1194_v39  ;;  %v359_v63 = vpop.f32.mrb[29].mxu0 }
 0x111   :  { %v360_v0 = vadd.f32 %v1194_v39, %v359_v63  ;;  %1011 = vmatprep.mubr.msk.f32.mxu1 %vm419_vm2, %v404_v59 }
 0x112   :  { %1012 = vmatmul.mubr.msk.f32.gmra.mrb[26].mxu1 %vm419_vm2, %v405_v61  ;;  %v407_v3 = vmax.f32 %v365_v62, 0.0 }
 0x113   :  { %v406_v1 = vmax.f32 %v360_v0, 0.0  ;;  %v963_v2 = vpop.f32.mrb[30].mxu0 }
 0x114   :  { %v375_v4 = vadd.f32 %v963_v2, %v1194_v39  ;;  %v369_v5 = vpop.f32.mrb[31].mxu0 }
 0x115   :  { %v370_v6 = vadd.f32 %v1194_v39, %v369_v5  ;;  %1014 = vmatprep.mubr.msk.f32.mxu1 %vm419_vm2, %v406_v1 }
 0x116   :  { %1015 = vmatmul.mubr.msk.f32.gmra.mrb[28].mxu1 %vm419_vm2, %v407_v3  ;;  %v409_v8 = vmax.f32 %v375_v4, 0.0 }
 0x117   :  { %v408_v7 = vmax.f32 %v370_v6, 0.0 }
 0x119   :  { %1017 = vmatprep.mubr.msk.f32.mxu1 %vm419_vm2, %v408_v7 }
 0x11a   :  { %1018 = vmatmul.mubr.msk.f32.gmra.mrb[30].mxu1 %vm419_vm2, %v409_v8 }
 0x1b1   :  { %v974_v10 = vpop.f32.mrb[0].mxu1 }
 0x1b2   :  { %v588_v11 = vadd.f32 %v974_v10, %v1263_v9  ;;  %v582_v39 = vpop.f32.mrb[1].mxu1 }
 0x1b3   :  { %v583_v12 = vadd.f32 %v1263_v9, %v582_v39 }
 0x1b4   :  { %743 = vst.msk [vmem:[%s1428_s3 + $0x8] sm:$0xff] %vm741_vm3, %v588_v11 }
 0x1b5   :  { %742 = vst.msk [vmem:[%s1428_s3] sm:$0xff] %vm741_vm3, %v583_v12  ;;  %v977_v13 = vpop.f32.mrb[2].mxu1 }
 0x1b6   :  { %v598_v14 = vadd.f32 %v977_v13, %v1263_v9  ;;  %v592_v15 = vpop.f32.mrb[3].mxu1 }
 0x1b7   :  { %v593_v16 = vadd.f32 %v1263_v9, %v592_v15 }
 0x1b8   :  { %745 = vst.msk [vmem:[%s1428_s3 + $0x18] sm:$0xff] %vm741_vm3, %v598_v14 }
 0x1b9   :  { %744 = vst.msk [vmem:[%s1428_s3 + $0x10] sm:$0xff] %vm741_vm3, %v593_v16  ;;  %v980_v17 = vpop.f32.mrb[4].mxu1 }
 0x1ba   :  { %v608_v18 = vadd.f32 %v980_v17, %v1263_v9  ;;  %v602_v19 = vpop.f32.mrb[5].mxu1 }
 0x1bb   :  { %v603_v20 = vadd.f32 %v1263_v9, %v602_v19 }
 0x1bc   :  { %747 = vst.msk [vmem:[%s1428_s3 + $0x28] sm:$0xff] %vm741_vm3, %v608_v18 }
 0x1bd   :  { %746 = vst.msk [vmem:[%s1428_s3 + $0x20] sm:$0xff] %vm741_vm3, %v603_v20  ;;  %v983_v21 = vpop.f32.mrb[6].mxu1 }
 0x1be   :  { %v618_v22 = vadd.f32 %v983_v21, %v1263_v9  ;;  %v612_v23 = vpop.f32.mrb[7].mxu1 }
 0x1bf   :  { %v613_v24 = vadd.f32 %v1263_v9, %v612_v23 }
 0x1c0   :  { %749 = vst.msk [vmem:[%s1428_s3 + $0x38] sm:$0xff] %vm741_vm3, %v618_v22 }
 0x1c1   :  { %748 = vst.msk [vmem:[%s1428_s3 + $0x30] sm:$0xff] %vm741_vm3, %v613_v24  ;;  %v986_v25 = vpop.f32.mrb[8].mxu1 }
 0x1c2   :  { %v628_v26 = vadd.f32 %v986_v25, %v1263_v9  ;;  %v622_v27 = vpop.f32.mrb[9].mxu1 }
 0x1c3   :  { %v623_v28 = vadd.f32 %v1263_v9, %v622_v27 }
 0x1c4   :  { %751 = vst.msk [vmem:[%s1428_s3 + $0x48] sm:$0xff] %vm741_vm3, %v628_v26 }
 0x1c5   :  { %750 = vst.msk [vmem:[%s1428_s3 + $0x40] sm:$0xff] %vm741_vm3, %v623_v28  ;;  %v989_v29 = vpop.f32.mrb[10].mxu1 }
 0x1c6   :  { %v638_v30 = vadd.f32 %v989_v29, %v1263_v9  ;;  %v632_v31 = vpop.f32.mrb[11].mxu1 }
 0x1c7   :  { %v633_v32 = vadd.f32 %v1263_v9, %v632_v31 }
 0x1c8   :  { %753 = vst.msk [vmem:[%s1428_s3 + $0x58] sm:$0xff] %vm741_vm3, %v638_v30 }
 0x1c9   :  { %752 = vst.msk [vmem:[%s1428_s3 + $0x50] sm:$0xff] %vm741_vm3, %v633_v32  ;;  %v992_v33 = vpop.f32.mrb[12].mxu1 }
 0x1ca   :  { %v648_v34 = vadd.f32 %v992_v33, %v1263_v9  ;;  %v642_v35 = vpop.f32.mrb[13].mxu1 }
 0x1cb   :  { %v643_v36 = vadd.f32 %v1263_v9, %v642_v35 }
 0x1cc   :  { %755 = vst.msk [vmem:[%s1428_s3 + $0x68] sm:$0xff] %vm741_vm3, %v648_v34 }
 0x1cd   :  { %754 = vst.msk [vmem:[%s1428_s3 + $0x60] sm:$0xff] %vm741_vm3, %v643_v36  ;;  %v995_v37 = vpop.f32.mrb[14].mxu1 }
 0x1ce   :  { %v658_v38 = vadd.f32 %v995_v37, %v1263_v9  ;;  %v652_v40 = vpop.f32.mrb[15].mxu1 }
 0x1cf   :  { %v653_v41 = vadd.f32 %v1263_v9, %v652_v40 }
 0x1d0   :  { %757 = vst.msk [vmem:[%s1428_s3 + $0x78] sm:$0xff] %vm741_vm3, %v658_v38 }
 0x1d1   :  { %756 = vst.msk [vmem:[%s1428_s3 + $0x70] sm:$0xff] %vm741_vm3, %v653_v41  ;;  %v998_v42 = vpop.f32.mrb[16].mxu1 }
 0x1d2   :  { %v668_v43 = vadd.f32 %v998_v42, %v1263_v9  ;;  %v662_v44 = vpop.f32.mrb[17].mxu1 }
 0x1d3   :  { %v663_v45 = vadd.f32 %v1263_v9, %v662_v44 }
 0x1d4   :  { %759 = vst.msk [vmem:[%s1428_s3 + $0x88] sm:$0xff] %vm741_vm3, %v668_v43 }
 0x1d5   :  { %758 = vst.msk [vmem:[%s1428_s3 + $0x80] sm:$0xff] %vm741_vm3, %v663_v45  ;;  %v1001_v46 = vpop.f32.mrb[18].mxu1 }
 0x1d6   :  { %v678_v47 = vadd.f32 %v1001_v46, %v1263_v9  ;;  %v672_v48 = vpop.f32.mrb[19].mxu1 }
 0x1d7   :  { %v673_v49 = vadd.f32 %v1263_v9, %v672_v48 }
 0x1d8   :  { %761 = vst.msk [vmem:[%s1428_s3 + $0x98] sm:$0xff] %vm741_vm3, %v678_v47 }
 0x1d9   :  { %760 = vst.msk [vmem:[%s1428_s3 + $0x90] sm:$0xff] %vm741_vm3, %v673_v49  ;;  %v1004_v50 = vpop.f32.mrb[20].mxu1 }
 0x1da   :  { %v688_v51 = vadd.f32 %v1004_v50, %v1263_v9  ;;  %v682_v52 = vpop.f32.mrb[21].mxu1 }
 0x1db   :  { %v683_v53 = vadd.f32 %v1263_v9, %v682_v52 }
 0x1dc   :  { %763 = vst.msk [vmem:[%s1428_s3 + $0xa8] sm:$0xff] %vm741_vm3, %v688_v51 }
 0x1dd   :  { %762 = vst.msk [vmem:[%s1428_s3 + $0xa0] sm:$0xff] %vm741_vm3, %v683_v53  ;;  %v1007_v54 = vpop.f32.mrb[22].mxu1 }
 0x1de   :  { %v698_v55 = vadd.f32 %v1007_v54, %v1263_v9  ;;  %v692_v56 = vpop.f32.mrb[23].mxu1 }
 0x1df   :  { %v693_v57 = vadd.f32 %v1263_v9, %v692_v56 }
 0x1e0   :  { %765 = vst.msk [vmem:[%s1428_s3 + $0xb8] sm:$0xff] %vm741_vm3, %v698_v55 }
 0x1e1   :  { %764 = vst.msk [vmem:[%s1428_s3 + $0xb0] sm:$0xff] %vm741_vm3, %v693_v57  ;;  %v1010_v58 = vpop.f32.mrb[24].mxu1 }
 0x1e2   :  { %v708_v59 = vadd.f32 %v1010_v58, %v1263_v9  ;;  %v702_v60 = vpop.f32.mrb[25].mxu1 }
 0x1e3   :  { %v703_v61 = vadd.f32 %v1263_v9, %v702_v60 }
 0x1e4   :  { %767 = vst.msk [vmem:[%s1428_s3 + $0xc8] sm:$0xff] %vm741_vm3, %v708_v59 }
 0x1e5   :  { %766 = vst.msk [vmem:[%s1428_s3 + $0xc0] sm:$0xff] %vm741_vm3, %v703_v61  ;;  %v1013_v62 = vpop.f32.mrb[26].mxu1 }
 0x1e6   :  { %v718_v63 = vadd.f32 %v1013_v62, %v1263_v9  ;;  %v712_v0 = vpop.f32.mrb[27].mxu1 }
 0x1e7   :  { %v713_v1 = vadd.f32 %v1263_v9, %v712_v0 }
 0x1e8   :  { %769 = vst.msk [vmem:[%s1428_s3 + $0xd8] sm:$0xff] %vm741_vm3, %v718_v63 }
 0x1e9   :  { %768 = vst.msk [vmem:[%s1428_s3 + $0xd0] sm:$0xff] %vm741_vm3, %v713_v1  ;;  %v1016_v2 = vpop.f32.mrb[28].mxu1 }
 0x1ea   :  { %v728_v3 = vadd.f32 %v1016_v2, %v1263_v9  ;;  %v722_v4 = vpop.f32.mrb[29].mxu1 }
 0x1eb   :  { %v723_v5 = vadd.f32 %v1263_v9, %v722_v4 }
 0x1ec   :  { %771 = vst.msk [vmem:[%s1428_s3 + $0xe8] sm:$0xff] %vm741_vm3, %v728_v3 }
 0x1ed   :  { %770 = vst.msk [vmem:[%s1428_s3 + $0xe0] sm:$0xff] %vm741_vm3, %v723_v5  ;;  %v1019_v6 = vpop.f32.mrb[30].mxu1 }
 0x1ee   :  { %v738_v7 = vadd.f32 %v1019_v6, %v1263_v9  ;;  %v732_v8 = vpop.f32.mrb[31].mxu1 }
 0x1ef   :  { %v733_v10 = vadd.f32 %v1263_v9, %v732_v8 }
 0x1f0   :  { %773 = vst.msk [vmem:[%s1428_s3 + $0xf8] sm:$0xff] %vm741_vm3, %v738_v7 }
 0x1f1   :  { %772 = vst.msk [vmem:[%s1428_s3 + $0xf0] sm:$0xff] %vm741_vm3, %v733_v10 }

</bundles_post_ra>
